<compile_context>
chip_gen: v7x
topology: tpu7x:2x2x1
jax: 0.10.0
libtpu: 0.0.40
codegen_flags: <defaults>
</compile_context>

<pallas_src>
import functools

import jax
import jax.numpy as jnp
from jax import lax
from jax.experimental import pallas as pl
from jax.experimental.pallas import tpu as pltpu


def gce_kernel(x_ref, t_ref, loss_ref, *, q):
    """Per-row GCE loss (1 - softmax(x)[i, t_i]**q) / q for one (TN, C) tile."""
    x = x_ref[...]                                            # (TN, C) native dtype
    t = t_ref[...]                                            # (TN, 1) int32 targets

    # Row max and target-logit gather in the native dtype (halves VALU work
    # for packed 16-bit inputs); no dynamic gather on TPU -> masked max.
    m = jnp.max(x, axis=1, keepdims=True)                     # (TN, 1)
    col = lax.broadcasted_iota(jnp.int32, x.shape, 1)         # (TN, C)
    neg = jnp.asarray(-jnp.inf, dtype=x.dtype)
    x_t = jnp.max(jnp.where(col == t, x, neg), axis=1, keepdims=True)

    # Only the exp/sum path runs in f32 (single exp pass over the tile).
    mf = m.astype(jnp.float32)
    sum_e = jnp.sum(jnp.exp(x.astype(jnp.float32) - mf), axis=1, keepdims=True)

    # p_t = exp(x_t - m) / sum_e; reciprocal only on the (TN, 1) column (EUP).
    p_t = jnp.exp(x_t.astype(jnp.float32) - mf) * pl.reciprocal(sum_e, approx=True)

    if q == 0.5:
        p_q = jnp.sqrt(p_t)                 # cheaper than pow -> log+exp
    else:
        p_q = jnp.power(p_t, q)

    loss_ref[...] = (1.0 - p_q) * (1.0 / q)                   # (TN, 1)


def _vmem_capacity_bytes():
    """Physical VMEM per TensorCore; conservative fallback if query fails."""
    try:
        return int(pltpu.get_tpu_info().vmem_capacity_bytes)
    except Exception:
        return 64 << 20   # v7x per-TC figure; safe lower bound everywhere


def _choose_tile_rows(n, c, itemsize, row_align, budget_bytes):
    """Biggest batch-tile height whose working set fits the VMEM budget.

    Per-row VMEM cost ~= 2 pipeline buffers of the native-dtype row plus
    ~3 f32-sized elementwise temporaries (cast / exp / masked-select).
    """
    per_row = 2 * c * itemsize + 3 * c * 4
    tn = (budget_bytes // max(1, per_row)) // row_align * row_align
    tn = max(row_align, min(tn, 1 << 16))          # sanity cap for tiny C only
    if n >= row_align:
        # Never make the block taller than the (row-aligned-down) batch.
        tn = min(tn, (n // row_align) * row_align)
    return tn


def gce_loss(logits, target, q=0.5, eps=1e-07, reduction="mean", tile_rows=None):
    """Pallas TPU implementation of GCELoss.forward.

    logits: (N, C) float array (any float dtype; streamed natively),
    target: (N,) integer class indices.  `eps` is unused (matches reference).
    """
    del eps  # defined but never used by the reference module
    N, C = logits.shape
    itemsize = jnp.dtype(logits.dtype).itemsize

    # Row alignment: 8 sublanes for 32-bit, 16 for 16-bit, 32 for 8-bit dtypes.
    row_align = 8 if itemsize >= 4 else (16 if itemsize == 2 else 32)

    # Scoped-VMEM budget: ~3/4 of physical, capped well below 128 MiB parts.
    vmem_cap = _vmem_capacity_bytes()
    vmem_limit = min((vmem_cap * 3) // 4, 96 << 20)

    if tile_rows is None:
        tn = _choose_tile_rows(N, C, itemsize, row_align, (vmem_limit * 3) // 4)
    else:
        tn = max(row_align, (int(tile_rows) // row_align) * row_align)

    num_tiles = pl.cdiv(N, tn)
    t2 = target.reshape(N, 1).astype(jnp.int32)

    per_row = pl.pallas_call(
        functools.partial(gce_kernel, q=float(q)),
        out_shape=jax.ShapeDtypeStruct((N, 1), jnp.float32),
        grid=(num_tiles,),
        in_specs=[
            pl.BlockSpec((tn, C), lambda i: (i, 0)),   # logits tile (native dtype)
            pl.BlockSpec((tn, 1), lambda i: (i, 0)),   # target column tile
        ],
        out_specs=pl.BlockSpec((tn, 1), lambda i: (i, 0)),
        compiler_params=pltpu.CompilerParams(
            dimension_semantics=("parallel",),
            vmem_limit_bytes=int(vmem_limit),
        ),
        cost_estimate=pl.CostEstimate(
            flops=5 * N * C,
            transcendentals=N * C,
            bytes_accessed=N * C * itemsize + N * 4 + N * 4,
        ),
    )(logits, t2)

    if reduction == "mean":
        # Output has exactly N rows (partial last block is a masked store),
        # so sum/N needs no slicing and is never biased by ragged tiles.
        return jnp.sum(per_row[:, 0]) / N
    return per_row                                   # (N, 1), matches torch gather


if __name__ == "__main__":
    # Deterministic small example: batch=50 (ragged vs. tile), classes=96.
    key = jax.random.PRNGKey(0)
    k1, k2 = jax.random.split(key)
    N, C = 50, 96
    logits = jax.random.normal(k1, (N, C), dtype=jnp.float32)
    target = jax.random.randint(k2, (N,), 0, C, dtype=jnp.int32)

    # Pure-JAX reference of the same math.
    p_ref = jax.nn.softmax(logits, axis=1)
    l_ref = jnp.mean((1.0 - jnp.sqrt(p_ref[jnp.arange(N), target])) / 0.5)

    # tile_rows=16 -> 4 grid steps with a PARTIAL (unpadded) last tile.
    loss = gce_loss(logits, target, q=0.5, tile_rows=16)
    jax.block_until_ready(loss)
    # Tolerance covers the EUP approximate reciprocal in the softmax denom.
    assert jnp.allclose(loss, l_ref, rtol=2e-3, atol=2e-3), (loss, l_ref)

    # Auto tile sizing path (VMEM-budget tiles, 2 grid steps here).
    loss_auto = gce_loss(logits, target, q=0.5)
    jax.block_until_ready(loss_auto)
    assert jnp.allclose(loss_auto, l_ref, rtol=2e-3, atol=2e-3), (loss_auto, l_ref)

    print("KERNEL_OK")
</pallas_src>

<mosaic_0001>
module attributes {stable_mosaic.version = 11 : i64} {
  func.func @gce_kernel(%arg0: i32, %arg1: memref<16x96xf32, #tpu.memory_space<vmem>>, %arg2: memref<16x1xi32, #tpu.memory_space<vmem>>, %arg3: memref<16x1xf32, #tpu.memory_space<vmem>>) attributes {dimension_semantics = [#tpu.dimension_semantics<parallel>], iteration_bounds = array<i64: 4>, scalar_prefetch = 0 : i64, scratch_operands = 0 : i64, tpu.core_type = #tpu.core_type<tc>, window_params = [{transform_indices = @transform_0, window_bounds = array<i64: 16, 96>}, {transform_indices = @transform_1, window_bounds = array<i64: 16, 1>}, {transform_indices = @transform_2, window_bounds = array<i64: 16, 1>}]} {
    %c0 = arith.constant 0 : index
    %c0_0 = arith.constant 0 : index
    %0 = vector.load %arg1[%c0, %c0_0] : memref<16x96xf32, #tpu.memory_space<vmem>>, vector<16x96xf32>
    %c0_1 = arith.constant 0 : index
    %c0_2 = arith.constant 0 : index
    %1 = vector.load %arg2[%c0_1, %c0_2] : memref<16x1xi32, #tpu.memory_space<vmem>>, vector<16x1xi32>
    %cst = arith.constant dense<0xFF800000> : vector<16xf32>
    %2 = vector.multi_reduction <maximumf>, %0, %cst [1] : vector<16x96xf32> to vector<16xf32>
    %3 = vector.shape_cast %2 : vector<16xf32> to vector<16x1xf32>
    %4 = tpu.iota {dimensions = array<i32: 1>} : vector<16x96xi32>
    %5 = vector.broadcast %1 : vector<16x1xi32> to vector<16x96xi32>
    %6 = arith.cmpi eq, %4, %5 : vector<16x96xi32>
    %cst_3 = arith.constant 0xFF800000 : f32
    %7 = vector.broadcast %cst_3 : f32 to vector<16x96xf32>
    %8 = arith.select %6, %0, %7 : vector<16x96xi1>, vector<16x96xf32>
    %cst_4 = arith.constant dense<0xFF800000> : vector<16xf32>
    %9 = vector.multi_reduction <maximumf>, %8, %cst_4 [1] : vector<16x96xf32> to vector<16xf32>
    %10 = vector.shape_cast %9 : vector<16xf32> to vector<16x1xf32>
    %11 = vector.broadcast %3 : vector<16x1xf32> to vector<16x96xf32>
    %12 = arith.subf %0, %11 : vector<16x96xf32>
    %13 = math.exp %12 : vector<16x96xf32>
    %cst_5 = arith.constant dense<0.000000e+00> : vector<16xf32>
    %14 = vector.multi_reduction <add>, %13, %cst_5 [1] : vector<16x96xf32> to vector<16xf32>
    %15 = vector.shape_cast %14 : vector<16xf32> to vector<16x1xf32>
    %16 = arith.subf %10, %3 : vector<16x1xf32>
    %17 = math.exp %16 : vector<16x1xf32>
    %18 = tpu.reciprocal %15 {approx = true} : vector<16x1xf32> -> vector<16x1xf32>
    %19 = arith.mulf %17, %18 : vector<16x1xf32>
    %20 = math.sqrt %19 : vector<16x1xf32>
    %cst_6 = arith.constant 1.000000e+00 : f32
    %21 = vector.broadcast %cst_6 : f32 to vector<16x1xf32>
    %22 = arith.subf %21, %20 : vector<16x1xf32>
    %cst_7 = arith.constant 2.000000e+00 : f32
    %23 = vector.broadcast %cst_7 : f32 to vector<16x1xf32>
    %24 = arith.mulf %22, %23 : vector<16x1xf32>
    %c0_8 = arith.constant 0 : index
    %c0_9 = arith.constant 0 : index
    %25 = vector.load %arg3[%c0_8, %c0_9] : memref<16x1xf32, #tpu.memory_space<vmem>>, vector<16x1xf32>
    tpu.vector_store %arg3[%c0_8, %c0_9], %24 {strides = array<i32>} : memref<16x1xf32, #tpu.memory_space<vmem>>, vector<16x1xf32>,
    return
  }
  func.func @transform_0(%arg0: i32) -> (i32, i32) {
    %c0_i32 = arith.constant 0 : i32
    %c0_i32_0 = arith.constant 0 : i32
    return %arg0, %c0_i32 : i32, i32
  }
  func.func @transform_1(%arg0: i32) -> (i32, i32) {
    %c0_i32 = arith.constant 0 : i32
    %c0_i32_0 = arith.constant 0 : i32
    return %arg0, %c0_i32 : i32, i32
  }
  func.func @transform_2(%arg0: i32) -> (i32, i32) {
    %c0_i32 = arith.constant 0 : i32
    %c0_i32_0 = arith.constant 0 : i32
    return %arg0, %c0_i32 : i32, i32
  }
}

</mosaic_0001>

<bundles_post_ra>
// kernel: tpu_custom_call.1
= control target key start
LH: loop header
LB: loop body
LE: loop exit
PB: predicated region body
PF: predicated region fallthrough
CT: control target
= control target key end

     0   :  { %s750_s9 = smov 0   ;;  %s752_s10 = smov 0   ;;  %s842_s0 = inlined_call_operand.vmem [shape: f32[50,96], index: 0, kind: input, shape index: {}]   ;;  %s843_s1 = inlined_call_operand.vmem [shape: s32[50,1], index: 1, kind: input, shape index: {}]   ;;  %s844_s2 = inlined_call_operand.vmem [shape: f32[50,1], index: 2, kind: output, shape index: {}]  }
   0x1   :  { %s754_s11 = smov 0  }
   0x2 LB: > { %s763_s12 = sadd.s32 4294967295, %s700_s11   ;;  %s765_s13 = sadd.s32 1, %s700_s11   ;;  %s700_s11 = sphi %s754_s11, %s848_s11   ;;  %s696_s10 = sphi %s752_s10, %s847_s10   ;;  %s692_s9 = sphi %s750_s9, %s846_s9  }
   0x3   : > { %s68_s14 = ssub.s32 %s700_s11, %s765_s13  ;;  %s71_s15 = sadd.s32 1, %s696_s10 }
   0x4   : > { %p69_p0 = scmp.eq.s32.totalorder %s68_s14, 0  ;;  %p81_p1 = scmp.ne.s32.totalorder %s696_s10, %s692_s9 }
   0x5   : > { %p82_p2 = scmp.eq.s32.totalorder %s763_s12, 3  ;;  %p513_p3 = scmp.ge.s32.totalorder %s700_s11, 1 }
   0x6   : > { %s773_s16 = scalar_select %p69_p0, %s696_s10, %s71_s15  }
   0x7   : > { %p775_p4 = por %p82_p2, %p81_p1  ;;  %p140_p5 = scmp.lt.s32.totalorder %s700_s11, 5 }
   0x9   : > { %p141_p6 = pnand %p513_p3, %p140_p5 }
   0xa   : > { %s780_s18 = sshll.u32 (!%p141_p6), %s763_s12, 1  ;;  %v734_v0 = vmov (!%p141_p6), 0   ;;  %vm211_vm0 = vcmask (!%p141_p6), 785408   ;;  %v218_v7 = vlaneseq (!%p141_p6)  ;;  %s171_s27 = sand.u32 (!%p141_p6), 1, %s692_s9   ;;  %vm276_vm5 = vcmask (!%p141_p6), 7168  }
   0xb   : > { %144 = sbr.rel (%p141_p6) target bundleno = 411 (0x19b), region = 28  ;;  %628 = vset.pattern.permute.xlu1 (!%p141_p6), %v734_v0  ;;  %p179_p7 = scmp.lt.s32.totalorder (!%p141_p6), %s780_s18, 6  ;;  %629 = vset.pattern.permute.xlu0 (!%p141_p6), %v734_v0 }
   0xc   : > { %v219_v8 = vand.u32 (!%p141_p6), 127, %v218_v7  ;;  %s514_s28 = sshll.u32 (!%p141_p6), %s171_s27, 4 }
   0xd   : > { %s797_s29 = scalar_lea.vmem (!%p141_p6), [#allocation2], %s514_s28  }
  0x12   : > { %s180_s19 = scalar_select %p179_p7, %s780_s18, 6 }
  0x13   : > { %s287_s30 = ssub.s32 (%p775_p4), 7, %s780_s18  ;;  %s536_s3 = sshll.u32 (%p775_p4), %s763_s12, 4 }
  0x14   : > { %s516_s20 = sshll.u32 %s180_s19, 3  ;;  %p288_p8 = scmp.lt.s32.totalorder (%p775_p4), %s287_s30, 2 }
  0x15   : > { %s196_s23 = scalar_lea.vmem %s843_s1, %s516_s20  ;;  %s182_s26 = scalar_lea.vmem %s842_s0, %s516_s20 }
  0x16   : > { %v209_v1 = vld [vmem:[%s196_s23] sm:$0xff]  ;;  %v208_v4 = vld [vmem:[%s182_s26 + $0x8] sm:$0xff]  ;;  %s808_s6 = scalar_lea.vmem (%p775_p4), %s844_s2, %s536_s3  }
  0x17   : > { %v207_v2 = vld [vmem:[%s182_s26] sm:$0xff]  ;;  %221 = vperm.xlu1 %628, %v209_v1   ;;  %v210_v5 = vld [vmem:[%s196_s23 + $0x8] sm:$0xff]  ;;  %v215_v6 = vsel %vm211_vm0, %v208_v4, -inf }
  0x18   : > { %v212_v3 = vsel %vm211_vm0, %v207_v2, -inf }
  0x19   : > { %213 = vmax.xlane.f32.xlu0 %v212_v3 }
  0x1b   : > { %224 = vperm.xlu1 %628, %v210_v5  }
  0x1d   : > { %216 = vmax.xlane.f32.xlu0 %v215_v6 }
  0x96   : > { %v222_v9 = vpop.permute.xlu1 %221 }
  0x97   : > { %vm226_vm1 = vcmp.eq.s32.totalorder %v219_v8, %v222_v9 }
  0x98   : > { %v228_v10 = vsel %vm226_vm1, %v207_v2, -inf }
  0x99   : > { %v230_v11 = vsel %vm211_vm0, %v228_v10, -inf }
  0x9a   : > { %v225_v12 = vpop.permute.xlu1 %224  ;;  %231 = vmax.xlane.f32.xlu0 %v230_v11 }
  0x9b   : > { %vm227_vm2 = vcmp.eq.s32.totalorder %v219_v8, %v225_v12 }
  0x9c   : > { %v229_v13 = vsel %vm227_vm2, %v208_v4, -inf }
  0x9d   : > { %v233_v14 = vsel %vm211_vm0, %v229_v13, -inf }
  0x9e   : > { %234 = vmax.xlane.f32.xlu1 %v233_v14 }
  0xa6   : > { %v214_v15 = vpop.xlane.xlu0 %213 }
  0xa7   : > { %v236_v16 = vsub.f32 %v207_v2, %v214_v15 }
  0xa9   : > { %v238_v17 = vmul.f32 1.442695, %v236_v16 }
  0xaa   : > { %v217_v18 = vpop.xlane.xlu0 %216 }
  0xab   : > { %630 = vpow2.f32 %v238_v17  ;;  %v237_v19 = vsub.f32 %v208_v4, %v217_v18 }
  0xad   : > { %v240_v20 = vmul.f32 1.442695, %v237_v19 }
  0xaf   : > { %632 = vpow2.f32 %v240_v20 }
  0xb5   : > { %v631_v21 = vpop.eup %630 }
  0xb6   : > { %v242_v22 = vsel %vm211_vm0, %v631_v21, 0.0 }
  0xb7   : > { %243 = vadd.xlane.f32.xlu0 %v242_v22 }
  0xb9   : > { %v633_v23 = vpop.eup %632 }
  0xba   : > { %v245_v24 = vsel %vm211_vm0, %v633_v23, 0.0 }
  0xbb   : > { %246 = vadd.xlane.f32.xlu0 %v245_v24 }
 0x127   : > { %v232_v25 = vpop.xlane.xlu0 %231 }
 0x128   : > { %v248_v26 = vsub.f32 %v232_v25, %v214_v15 }
 0x12a   : > { %v250_v28 = vmul.f32 1.442695, %v248_v26 }
 0x12b   : > { %v235_v27 = vpop.xlane.xlu1 %234 }
 0x12c   : > { %v249_v29 = vsub.f32 %v235_v27, %v217_v18  ;;  %634 = vpow2.f32 %v250_v28 }
 0x12e   : > { %v252_v30 = vmul.f32 1.442695, %v249_v29 }
 0x136   : > { %v635_v33 = vpop.eup %634 }
 0x144   : > { %v244_v31 = vpop.xlane.xlu0 %243 }
 0x145   : > { %636 = vrcp.f32 %v244_v31 }
 0x146   : > { %638 = vpow2.f32 %v252_v30 }
 0x148   : > { %v247_v32 = vpop.xlane.xlu0 %246 }
 0x149   : > { %640 = vrcp.f32 %v247_v32 }
 0x14f   : > { %v637_v34 = vpop.eup %636 }
 0x150   : > { %v256_v35 = vmul.f32 %v637_v34, %v635_v33  ;;  %v639_v36 = vpop.eup %638 }
 0x152   : > { %642 = vrsqrt.f32 %v256_v35  ;;  %vm260_vm3 = vcmp.eq.f32.partialorder %v256_v35, inf  ;;  %v263_v41 = vand.u32 2147483648, %v256_v35  ;;  %vm262_vm4 = vcmp.eq.f32.partialorder %v256_v35, 0.0 }
 0x153   : > { %v641_v37 = vpop.eup %640 }
 0x154   : > { %v257_v38 = vmul.f32 %v641_v37, %v639_v36 }
 0x156   : > { %644 = vrsqrt.f32 %v257_v38  ;;  %vm267_vm6 = vcmp.eq.f32.partialorder %v257_v38, inf  ;;  %v270_v47 = vand.u32 2147483648, %v257_v38  ;;  %vm269_vm7 = vcmp.eq.f32.partialorder %v257_v38, 0.0 }
 0x15c   : > { %v643_v39 = vpop.eup %642 }
 0x15d   : > { %v259_v40 = vmul.f32 %v643_v39, %v256_v35 }
 0x15f   : > { %v261_v42 = vsel %vm260_vm3, %v256_v35, %v259_v40 }
 0x160   : > { %v645_v43 = vpop.eup %644  ;;  %v264_v44 = vsel %vm262_vm4, %v263_v41, %v261_v42 }
 0x161   : > { %v272_v45 = vsub.f32 1.0, %v264_v44  ;;  %v266_v46 = vmul.f32 %v645_v43, %v257_v38 }
 0x163   : > { %v274_v48 = vmul.f32 2.0, %v272_v45  ;;  %v268_v49 = vsel %vm267_vm6, %v257_v38, %v266_v46  ;;  %285 = sbr.rel (!%p775_p4) target bundleno = 411 (0x19b), region = 32 }
 0x164   : > { %v271_v50 = vsel %vm269_vm7, %v270_v47, %v268_v49 }
 0x165   : > { %277 = vst.msk [vmem:[%s797_s29] sm:$0xff] %vm276_vm5, %v274_v48  ;;  %v273_v51 = vsub.f32 1.0, %v271_v50 }
 0x167   : > { %v275_v52 = vmul.f32 2.0, %v273_v51 }
 0x169   : > { %278 = vst.msk [vmem:[%s797_s29 + $0x8] sm:$0xff] %vm276_vm5, %v275_v52 }
 0x16a   : > { %s850_s30 = smov (!%p288_p8, %s287_s30), 2 }
 0x16b   : > { %s521_s7 = sshll.u32 %s850_s30, 7 }
 0x16c   : > { %p524_p9 = scmp.eq.s32.totalorder %s521_s7, 0 }
 0x16d   : > { %s814_s8 = sshrl.u32 (!%p524_p9), %s850_s30, 1 }
 0x16e   : > { %296 = sbr.rel (%p524_p9) target bundleno = 411 (0x19b), region = 36  ;;  %p525_p10 = scmp.le.s32.totalorder (!%p524_p9), %s814_s8, 0 }
 0x175   : > { %460 = sbr.rel (%p525_p10) target bundleno = 390 (0x186), region = 115  ;;  %s702_s9 = smov (!%p525_p10), %s808_s6  }
 0x176   : > { %s706_s11 = smov (!%p525_p10), %s797_s29   ;;  %s710_s12 = smov (!%p525_p10), 0  }
 0x177   : > { %s714_s14 = smov (!%p525_p10), 0  }
 0x17c LB: >> { %v360_v53 = vld [vmem:[%s708_s11] sm:$0xff]  ;;  %v362_v54 = vld [vmem:[%s708_s11 + $0x8] sm:$0xff]  ;;  %s364_s15 = sadd.s32 1, %s712_s12  ;;  %s354_s14 = sadd.s32 1, %s716_s14   ;;  %s716_s14 = sphi %s714_s14, %s354_s14   ;;  %s712_s12 = sphi %s710_s12, %s711_s12   ;;  %s708_s11 = sphi %s706_s11, %s369_s11   ;;  %s704_s9 = sphi %s702_s9, %s370_s9  }
 0x17d   : >> { %361 = vst [vmem:[%s704_s9] sm:$0xff] %v360_v53  ;;  %363 = vst [vmem:[%s704_s9 + $0x8] sm:$0xff] %v362_v54  ;;  %p365_p11 = scmp.ge.s32.totalorder %s364_s15, %s814_s8  ;;  %p353_p12 = scmp.ge.s32.totalorder %s354_s14, %s814_s8 }
 0x17f   : >> { %s852_s15 = smov (%p365_p11, %s364_s15), 0  ;;  %356 = sbr.rel (!%p353_p12) target bundleno = 380 (0x17c), region = 121 }
 0x180   : >> { %s526_s17 = sshll.u32 %s852_s15, 4  ;;  %s711_s12 = smov %s852_s15  }
 0x181   : >> { %s369_s11 = scalar_lea.vmem %s797_s29, %s526_s17 [#allocation2]   ;;  %s370_s9 = scalar_lea.vmem %s808_s6, %s526_s17  }
 0x186 PF: > { %s824_s18 = sand.u32 1, %s850_s30   ;;  %s537_s19 = sshll.u32 %s814_s8, 4 }
 0x187   : > { %s375_s20 = scalar_lea.vmem %s797_s29, %s537_s19 [#allocation2]   ;;  %s377_s21 = scalar_lea.vmem %s808_s6, %s537_s19  }
 0x188   : > { %p531_p13 = scmp.le.s32.totalorder %s824_s18, 0 }
 0x189   : > { %s718_s22 = smov (!%p531_p13), %s377_s21   ;;  %s722_s23 = smov (!%p531_p13), %s375_s20  }
 0x18a   : > { %474 = sbr.rel (%p531_p13) target bundleno = 411 (0x19b), region = 126  ;;  %s726_s24 = smov (!%p531_p13), 0  }
 0x18b   : > { %s730_s25 = smov (!%p531_p13), 0  }
 0x191 LB: >> { %v387_v55 = vld [vmem:[%s724_s23] sm:$0xff]  ;;  %s389_s26 = sadd.s32 1, %s728_s24  ;;  %s381_s25 = sadd.s32 1, %s732_s25   ;;  %s732_s25 = sphi %s730_s25, %s381_s25   ;;  %s728_s24 = sphi %s726_s24, %s727_s24   ;;  %s724_s23 = sphi %s722_s23, %s394_s23   ;;  %s720_s22 = sphi %s718_s22, %s395_s22  }
 0x192   : >> { %388 = vst [vmem:[%s720_s22] sm:$0xff] %v387_v55  ;;  %p390_p0 = scmp.ge.s32.totalorder %s389_s26, %s824_s18  ;;  %p380_p1 = scmp.ge.s32.totalorder %s381_s25, %s824_s18 }
 0x194   : >> { %s854_s26 = smov (%p390_p0, %s389_s26), 0  ;;  %383 = sbr.rel (!%p380_p1) target bundleno = 401 (0x191), region = 132 }
 0x195   : >> { %s532_s27 = sshll.u32 %s854_s26, 3  ;;  %s727_s24 = smov %s854_s26  }
 0x196   : >> { %s394_s23 = scalar_lea.vmem %s375_s20, %s532_s27 [#allocation2]   ;;  %s395_s22 = scalar_lea.vmem %s377_s21, %s532_s27  }
 0x19b PF: > { %p9_p2 = scmp.ge.s32.totalorder %s765_s13, 6   ;;  %s846_s9 = smov %s696_s10 }
 0x19c   : > { %s847_s10 = smov %s773_s16  ;;  %s848_s11 = smov %s765_s13 }
 0x19d   :  { %11 = sbr.rel (!%p9_p2) target bundleno = 2 (0x2), region = 143 }

</bundles_post_ra>
